<compile_context>
chip_gen: v7x
topology: tpu7x:2x2x1
jax: 0.10.0
libtpu: 0.0.40
codegen_flags: <defaults>
</compile_context>

<pallas_src>
import math
import numpy as np
import jax
import jax.numpy as jnp
from jax.experimental import pallas as pl
from jax.experimental.pallas import tpu as pltpu


# ----------------------------- parameter setup ------------------------------

def _round_up(x: int, m: int) -> int:
    return ((x + m - 1) // m) * m


def fixed_embedding_table(c_in: int, d_model: int) -> np.ndarray:
    """Deterministic sinusoidal table, identical to FixedEmbedding.__init__."""
    w = np.zeros((c_in, d_model), dtype=np.float32)
    position = np.arange(0, c_in, dtype=np.float32)[:, None]
    div_term = np.exp(
        np.arange(0, d_model, 2, dtype=np.float32) * -(math.log(10000.0) / d_model)
    )
    w[:, 0::2] = np.sin(position * div_term)
    w[:, 1::2] = np.cos(position * div_term)
    return w


def build_temporal_tables(d_model: int, freq: str = "h", minute: int = 6):
    """Build the (block-diagonal) concatenated table.

    Returns (table_bd [p*c_blk, out_cols] f32, offsets [K] int32, sizes, p, c_blk).

    Field order matches x[:, :, k] in the PyTorch forward:
      0 -> month (13), 1 -> day (32), 2 -> weekday (7), 3 -> hour (24),
      4 -> minute (minute)  [only if freq == 't']

    When d_model divides 128, p = 128 // d_model tokens are packed per output
    row: block j of the block-diagonal table occupies rows
    [j*c_blk, j*c_blk + c_total) and columns [j*d_model, (j+1)*d_model).
    Padded rows are never selected (the one-hot cannot hit them).
    """
    sizes = [13, 32, 7, 24] + ([minute] if freq == "t" else [])
    tables = [fixed_embedding_table(s, d_model) for s in sizes]
    offsets = np.cumsum([0] + sizes[:-1]).astype(np.int32)
    concat = np.concatenate(tables, axis=0)                  # [c_total, d_model]
    c_total = concat.shape[0]
    c_blk = _round_up(c_total, 128)

    if d_model < 128 and 128 % d_model == 0:
        p = 128 // d_model                                   # packed: out_cols = 128
        out_cols = p * d_model
    else:
        p = 1
        out_cols = _round_up(d_model, 128)                   # lane-pad D

    table_bd = np.zeros((p * c_blk, out_cols), dtype=np.float32)
    for j in range(p):
        table_bd[j * c_blk: j * c_blk + c_total,
                 j * d_model: (j + 1) * d_model] = concat
    return table_bd, offsets, sizes, p, c_blk


# --------------------------------- kernel -----------------------------------

def make_temporal_embedding_kernel(p: int, k: int, c_blk: int):
    """p: tokens packed per output row, k: calendar fields, c_blk: rows/block."""

    def kernel(idx_ref, w_ref, o_ref):
        # idx_ref: [rows, p*k]            int32 (field offsets already applied)
        # w_ref:   [p*c_blk, out_cols]    f32   (resident: constant index_map)
        # o_ref:   [rows, out_cols]       f32
        idx = idx_ref[...]
        rows = idx.shape[0]

        # One shared narrow iota; each packed slot compares its own K index
        # columns against it, so total VPU compare work is independent of p.
        iota = jax.lax.broadcasted_iota(jnp.int32, (rows, c_blk), 1)

        pieces = []
        for j in range(p):                                   # p, k tiny & static
            oh = iota == idx[:, j * k: j * k + 1]
            for kk in range(1, k):
                # Disjoint per-field offsets -> OR of compares == summed one-hot.
                oh = oh | (iota == idx[:, j * k + kk: j * k + kk + 1])
            pieces.append(oh.astype(jnp.float32))

        # Lane-boundary concat (each piece is exactly 128 lanes wide): cheap
        # vreg placement, no cross-lane shuffles.
        onehot = pieces[0] if p == 1 else jnp.concatenate(pieces, axis=-1)

        # Summed one-hot x block-diagonal table == packed gathered-row sums.
        o_ref[...] = jnp.dot(onehot, w_ref[...],
                             preferred_element_type=jnp.float32)

    return kernel


# -------------------------------- wrapper ------------------------------------

def _choose_tn(n: int, p: int, out_cols: int) -> int:
    """Tokens per grid step.

    Multiple of 8*p so output block rows are a multiple of 8 (sublane rule).
    Capped so the double-buffered output tile stays <= ~8 MiB (well under the
    smallest scoped-VMEM default, v5e's 16 MiB) and near cdiv(n, 2) so the grid
    keeps >= 2 steps when there is enough work (v7x megacore sharding).
    """
    granule = 8 * p
    if n <= granule:
        return granule
    vmem_cap = ((1 << 20) * p) // out_cols        # from 2*(tn/p)*out_cols*4 <= 8 MiB
    tn = min(2048, vmem_cap, _round_up(pl.cdiv(n, 2), granule))
    return max(granule, (tn // granule) * granule)


def temporal_embedding(x_idx: jax.Array, table_bd: jax.Array,
                       offsets: np.ndarray, sizes, d_model: int,
                       p: int, c_blk: int, *, tn: int | None = None) -> jax.Array:
    """x_idx: [B, L, K] integer time features. Returns [B, L, d_model] f32."""
    b, l, k = x_idx.shape
    n = b * l
    out_cols = table_bd.shape[1]

    # Glue: clamp each field to its valid range (OOB calendar values are
    # silently clamped, unlike nn.Embedding which would raise), add per-field
    # offsets into the concatenated table, flatten, pad N to a tile multiple.
    sizes_arr = jnp.asarray(list(sizes), jnp.int32)
    x_i = jnp.clip(x_idx.astype(jnp.int32), 0, sizes_arr[None, None, :] - 1)
    idx = (x_i + jnp.asarray(offsets, jnp.int32)[None, None, :]).reshape(n, k)

    tn = tn if tn is not None else _choose_tn(n, p, out_cols)
    n_pad = _round_up(max(n, 1), tn)
    if n_pad != n:
        idx = jnp.pad(idx, ((0, n_pad - n), (0, 0)))

    rows = n_pad // p
    trows = tn // p
    # Row g packs tokens [g*p, (g+1)*p); columns [j*k, (j+1)*k) are token j's fields.
    idx_packed = idx.reshape(rows, p * k)

    out = pl.pallas_call(
        make_temporal_embedding_kernel(p, k, c_blk),
        out_shape=jax.ShapeDtypeStruct((rows, out_cols), jnp.float32),
        grid_spec=pltpu.PrefetchScalarGridSpec(
            num_scalar_prefetch=0,
            grid=(rows // trows,),
            in_specs=[
                pl.BlockSpec((trows, p * k), lambda i: (i, 0)),       # index tile
                pl.BlockSpec(table_bd.shape, lambda i: (0, 0)),       # resident table
            ],
            out_specs=pl.BlockSpec((trows, out_cols), lambda i: (i, 0)),
        ),
        compiler_params=pltpu.CompilerParams(
            dimension_semantics=("parallel",),   # shards grid across TCs on v7x
        ),
    )(idx_packed, table_bd)

    # Packed: [rows, p*d_model] is row-major identical to [n_pad, d_model]
    # -> free reshape, no padded-column writeback or epilogue column slice.
    out = out.reshape(n_pad, out_cols // p)
    if out.shape[1] != d_model:          # only the p == 1, lane-padded-D case
        out = out[:, :d_model]
    if n_pad != n:                       # only when N needed padding
        out = out[:n]
    return out.reshape(b, l, d_model)


# ----------------------------------- main ------------------------------------

if __name__ == "__main__":
    d_model = 32
    freq = "h"            # PyTorch default -> 4 calendar fields (no minute)
    B, L = 2, 8

    table_np, offsets, sizes, p, c_blk = build_temporal_tables(d_model, freq=freq)
    table = jnp.asarray(table_np)        # [512, 128] block-diagonal, f32

    # Deterministic synthetic time features within each field's valid range.
    key = jax.random.PRNGKey(0)
    keys = jax.random.split(key, len(sizes))
    cols = [jax.random.randint(keys[i], (B, L), 0, sizes[i], dtype=jnp.int32)
            for i in range(len(sizes))]
    x = jnp.stack(cols, axis=-1)         # [B, L, K], order [month, day, weekday, hour]

    out = temporal_embedding(x, table, offsets, sizes, d_model, p, c_blk)
    out = jax.block_until_ready(out)

    # Pure-JAX reference (plain gathers + sum), same semantics as the PyTorch forward.
    c_total = int(np.sum(sizes))
    table_ref = table[:c_total, :d_model]          # block 0 of the block-diag table
    idx_off = x.astype(jnp.int32) + jnp.asarray(offsets, jnp.int32)[None, None, :]
    ref = jnp.take(table_ref, idx_off, axis=0).sum(axis=2)

    assert out.shape == (B, L, d_model)
    assert out.dtype == jnp.float32
    np.testing.assert_allclose(np.asarray(out), np.asarray(ref), rtol=1e-5, atol=1e-5)
    print("KERNEL_OK")
</pallas_src>

<mosaic_0001>
module attributes {stable_mosaic.version = 11 : i64} {
  func.func @kernel(%arg0: i32, %arg1: memref<8x16xi32, #tpu.memory_space<vmem>>, %arg2: memref<512x128xf32, #tpu.memory_space<vmem>>, %arg3: memref<8x128xf32, #tpu.memory_space<vmem>>) attributes {dimension_semantics = [#tpu.dimension_semantics<parallel>], iteration_bounds = array<i64: 1>, scalar_prefetch = 0 : i64, scratch_operands = 0 : i64, tpu.core_type = #tpu.core_type<tc>, window_params = [{transform_indices = @transform_0, window_bounds = array<i64: 8, 16>}, {pipeline_mode = #tpu.pipeline_mode<synchronous>, transform_indices = @transform_1, window_bounds = array<i64: 512, 128>}, {transform_indices = @transform_2, window_bounds = array<i64: 8, 128>}]} {
    %c0 = arith.constant 0 : index
    %c0_0 = arith.constant 0 : index
    %0 = vector.load %arg1[%c0, %c0_0] : memref<8x16xi32, #tpu.memory_space<vmem>>, vector<8x16xi32>
    %1 = tpu.iota {dimensions = array<i32: 1>} : vector<8x128xi32>
    %2 = vector.extract_strided_slice %0 {offsets = [0, 0], sizes = [8, 1], strides = [1, 1]} : vector<8x16xi32> to vector<8x1xi32>
    %3 = vector.broadcast %2 : vector<8x1xi32> to vector<8x128xi32>
    %4 = arith.cmpi eq, %1, %3 : vector<8x128xi32>
    %5 = vector.extract_strided_slice %0 {offsets = [0, 1], sizes = [8, 1], strides = [1, 1]} : vector<8x16xi32> to vector<8x1xi32>
    %6 = vector.broadcast %5 : vector<8x1xi32> to vector<8x128xi32>
    %7 = arith.cmpi eq, %1, %6 : vector<8x128xi32>
    %8 = arith.ori %4, %7 : vector<8x128xi1>
    %9 = vector.extract_strided_slice %0 {offsets = [0, 2], sizes = [8, 1], strides = [1, 1]} : vector<8x16xi32> to vector<8x1xi32>
    %10 = vector.broadcast %9 : vector<8x1xi32> to vector<8x128xi32>
    %11 = arith.cmpi eq, %1, %10 : vector<8x128xi32>
    %12 = arith.ori %8, %11 : vector<8x128xi1>
    %13 = vector.extract_strided_slice %0 {offsets = [0, 3], sizes = [8, 1], strides = [1, 1]} : vector<8x16xi32> to vector<8x1xi32>
    %14 = vector.broadcast %13 : vector<8x1xi32> to vector<8x128xi32>
    %15 = arith.cmpi eq, %1, %14 : vector<8x128xi32>
    %16 = arith.ori %12, %15 : vector<8x128xi1>
    %17 = arith.extui %16 : vector<8x128xi1> to vector<8x128xi32>
    %18 = arith.sitofp %17 : vector<8x128xi32> to vector<8x128xf32>
    %19 = vector.extract_strided_slice %0 {offsets = [0, 4], sizes = [8, 1], strides = [1, 1]} : vector<8x16xi32> to vector<8x1xi32>
    %20 = vector.broadcast %19 : vector<8x1xi32> to vector<8x128xi32>
    %21 = arith.cmpi eq, %1, %20 : vector<8x128xi32>
    %22 = vector.extract_strided_slice %0 {offsets = [0, 5], sizes = [8, 1], strides = [1, 1]} : vector<8x16xi32> to vector<8x1xi32>
    %23 = vector.broadcast %22 : vector<8x1xi32> to vector<8x128xi32>
    %24 = arith.cmpi eq, %1, %23 : vector<8x128xi32>
    %25 = arith.ori %21, %24 : vector<8x128xi1>
    %26 = vector.extract_strided_slice %0 {offsets = [0, 6], sizes = [8, 1], strides = [1, 1]} : vector<8x16xi32> to vector<8x1xi32>
    %27 = vector.broadcast %26 : vector<8x1xi32> to vector<8x128xi32>
    %28 = arith.cmpi eq, %1, %27 : vector<8x128xi32>
    %29 = arith.ori %25, %28 : vector<8x128xi1>
    %30 = vector.extract_strided_slice %0 {offsets = [0, 7], sizes = [8, 1], strides = [1, 1]} : vector<8x16xi32> to vector<8x1xi32>
    %31 = vector.broadcast %30 : vector<8x1xi32> to vector<8x128xi32>
    %32 = arith.cmpi eq, %1, %31 : vector<8x128xi32>
    %33 = arith.ori %29, %32 : vector<8x128xi1>
    %34 = arith.extui %33 : vector<8x128xi1> to vector<8x128xi32>
    %35 = arith.sitofp %34 : vector<8x128xi32> to vector<8x128xf32>
    %36 = vector.extract_strided_slice %0 {offsets = [0, 8], sizes = [8, 1], strides = [1, 1]} : vector<8x16xi32> to vector<8x1xi32>
    %37 = vector.broadcast %36 : vector<8x1xi32> to vector<8x128xi32>
    %38 = arith.cmpi eq, %1, %37 : vector<8x128xi32>
    %39 = vector.extract_strided_slice %0 {offsets = [0, 9], sizes = [8, 1], strides = [1, 1]} : vector<8x16xi32> to vector<8x1xi32>
    %40 = vector.broadcast %39 : vector<8x1xi32> to vector<8x128xi32>
    %41 = arith.cmpi eq, %1, %40 : vector<8x128xi32>
    %42 = arith.ori %38, %41 : vector<8x128xi1>
    %43 = vector.extract_strided_slice %0 {offsets = [0, 10], sizes = [8, 1], strides = [1, 1]} : vector<8x16xi32> to vector<8x1xi32>
    %44 = vector.broadcast %43 : vector<8x1xi32> to vector<8x128xi32>
    %45 = arith.cmpi eq, %1, %44 : vector<8x128xi32>
    %46 = arith.ori %42, %45 : vector<8x128xi1>
    %47 = vector.extract_strided_slice %0 {offsets = [0, 11], sizes = [8, 1], strides = [1, 1]} : vector<8x16xi32> to vector<8x1xi32>
    %48 = vector.broadcast %47 : vector<8x1xi32> to vector<8x128xi32>
    %49 = arith.cmpi eq, %1, %48 : vector<8x128xi32>
    %50 = arith.ori %46, %49 : vector<8x128xi1>
    %51 = arith.extui %50 : vector<8x128xi1> to vector<8x128xi32>
    %52 = arith.sitofp %51 : vector<8x128xi32> to vector<8x128xf32>
    %53 = vector.extract_strided_slice %0 {offsets = [0, 12], sizes = [8, 1], strides = [1, 1]} : vector<8x16xi32> to vector<8x1xi32>
    %54 = vector.broadcast %53 : vector<8x1xi32> to vector<8x128xi32>
    %55 = arith.cmpi eq, %1, %54 : vector<8x128xi32>
    %56 = vector.extract_strided_slice %0 {offsets = [0, 13], sizes = [8, 1], strides = [1, 1]} : vector<8x16xi32> to vector<8x1xi32>
    %57 = vector.broadcast %56 : vector<8x1xi32> to vector<8x128xi32>
    %58 = arith.cmpi eq, %1, %57 : vector<8x128xi32>
    %59 = arith.ori %55, %58 : vector<8x128xi1>
    %60 = vector.extract_strided_slice %0 {offsets = [0, 14], sizes = [8, 1], strides = [1, 1]} : vector<8x16xi32> to vector<8x1xi32>
    %61 = vector.broadcast %60 : vector<8x1xi32> to vector<8x128xi32>
    %62 = arith.cmpi eq, %1, %61 : vector<8x128xi32>
    %63 = arith.ori %59, %62 : vector<8x128xi1>
    %64 = vector.extract_strided_slice %0 {offsets = [0, 15], sizes = [8, 1], strides = [1, 1]} : vector<8x16xi32> to vector<8x1xi32>
    %65 = vector.broadcast %64 : vector<8x1xi32> to vector<8x128xi32>
    %66 = arith.cmpi eq, %1, %65 : vector<8x128xi32>
    %67 = arith.ori %63, %66 : vector<8x128xi1>
    %68 = arith.extui %67 : vector<8x128xi1> to vector<8x128xi32>
    %69 = arith.sitofp %68 : vector<8x128xi32> to vector<8x128xf32>
    %70 = tpu.concatenate %18, %35, %52, %69 in 1 : vector<8x128xf32>, vector<8x128xf32>, vector<8x128xf32>, vector<8x128xf32> -> vector<8x512xf32>
    %c0_1 = arith.constant 0 : index
    %c0_2 = arith.constant 0 : index
    %71 = vector.load %arg2[%c0_1, %c0_2] : memref<512x128xf32, #tpu.memory_space<vmem>>, vector<512x128xf32>
    %cst = arith.constant dense<0.000000e+00> : vector<8x128xf32>
    %72 = tpu.matmul %70, %71, %cst {dimension_numbers = #tpu.dot_dimension_numbers<[1], [0], [0], [1], [0, 0, 1, 1], [], []>} : vector<8x512xf32>, vector<512x128xf32>, vector<8x128xf32> -> vector<8x128xf32>
    %c0_3 = arith.constant 0 : index
    %c0_4 = arith.constant 0 : index
    %73 = vector.load %arg3[%c0_3, %c0_4] : memref<8x128xf32, #tpu.memory_space<vmem>>, vector<8x128xf32>
    tpu.vector_store %arg3[%c0_3, %c0_4], %72 {strides = array<i32>} : memref<8x128xf32, #tpu.memory_space<vmem>>, vector<8x128xf32>,
    return
  }
  func.func @transform_0(%arg0: i32) -> (i32, i32) {
    %c0_i32 = arith.constant 0 : i32
    %c0_i32_0 = arith.constant 0 : i32
    return %arg0, %c0_i32 : i32, i32
  }
  func.func @transform_1(%arg0: i32) -> (i32, i32) {
    %c0_i32 = arith.constant 0 : i32
    %c0_i32_0 = arith.constant 0 : i32
    %c0_i32_1 = arith.constant 0 : i32
    return %c0_i32, %c0_i32_0 : i32, i32
  }
  func.func @transform_2(%arg0: i32) -> (i32, i32) {
    %c0_i32 = arith.constant 0 : i32
    %c0_i32_0 = arith.constant 0 : i32
    return %arg0, %c0_i32 : i32, i32
  }
}

</mosaic_0001>

<bundles_post_ra>
// kernel: tpu_custom_call.1
= control target key start
LH: loop header
LB: loop body
LE: loop exit
PB: predicated region body
PF: predicated region fallthrough
CT: control target
= control target key end

     0   :  { %7 = vsyncpa [#allocation3], 0  ;;  %s697_s0 = inlined_call_operand.hbm [shape: s32[8,16], index: 0, kind: input, shape index: {}]   ;;  %s698_s1 = inlined_call_operand.hbm [shape: f32[512,128], index: 1, kind: input, shape index: {}]   ;;  %s699_s2 = inlined_call_operand.hbm [shape: f32[8,128], index: 2, kind: output, shape index: {}]  }
   0x1   :  { %8 = vsyncpa [#allocation6], 0 }
   0x2   :  { %9 = vsyncpa [#allocation4], 0  ;;  %s599_s9 = smov [#allocation2]   ;;  %s600_s11 = smov [#allocation5]  }
   0x3   :  { %s16_s10 = sshll.u32 %s599_s9, 4  ;;  %s25_s12 = sshll.u32 %s600_s11, 4  ;;  %s17_s10 = int_to_ptr.vmem [resolvable:$true] %s16_s10  ;;  %s636_s12 = int_to_ptr.vmem [resolvable:$true] %s25_s12 }
   0x4   :  { %s527_s15 = scalar_lea.hbm %s697_s0, 128 }
   0x5   :  { %p528_p0 = scmp.ne.s32.totalorder %s697_s0, %s527_s15  ;;  %p531_p1 = scmp.lt.u32.totalorder %s527_s15, %s697_s0 }
   0x7   :  { %p533_p2 = pnand %p531_p1, %p528_p0 }
   0x9   :  { %536 = shalt.err (!%p533_p2)
}
   0xa   :  { %s537_s20 = scalar_lea.vmem %s17_s10, 128  ;;  %p542_p4 = scmp.lt.s32.totalorder %s17_s10, %s17_s10 }
   0xb   :  { %p538_p3 = scmp.ne.s32.totalorder %s17_s10, %s537_s20  ;;  %p543_p5 = scmp.lt.s32.totalorder %s537_s20, %s537_s20 }
   0xd   :  { %p544_p6 = por %p543_p5, %p542_p4 }
   0xf   :  { %p545_p7 = pnand %p544_p6, %p538_p3 }
  0x11   :  { %548 = shalt.err (!%p545_p7)
}
  0x12   :  { %19 = dma.hbm_to_vmem [thread:$0]  %s697_s0, 128, %s17_s10, [#allocation3]  }
  0x13   :  { %s549_s25 = scalar_lea.hbm %s698_s1, 8192 }
  0x14   :  { %p550_p8 = scmp.ne.s32.totalorder %s698_s1, %s549_s25  ;;  %p553_p9 = scmp.lt.u32.totalorder %s549_s25, %s698_s1 }
  0x16   :  { %p555_p10 = pnand %p553_p9, %p550_p8 }
  0x18   :  { %558 = shalt.err (!%p555_p10)
}
  0x19   :  { %s559_s30 = scalar_lea.vmem %s636_s12, 8192  ;;  %p564_p12 = scmp.lt.s32.totalorder %s636_s12, %s636_s12 }
  0x1a   :  { %p560_p11 = scmp.ne.s32.totalorder %s636_s12, %s559_s30  ;;  %p565_p13 = scmp.lt.s32.totalorder %s559_s30, %s559_s30 }
  0x1c   :  { %p566_p0 = por %p565_p13, %p564_p12 }
  0x1e   :  { %p567_p1 = pnand %p566_p0, %p560_p11 }
  0x20   :  { %570 = shalt.err (!%p567_p1)
}
  0x21   :  { %s601_s0 = smov 128   ;;  %s602_s3 = smov 8  }
  0x22   :  { %31 = dma.hbm_to_vmem [thread:$0]  %s698_s1, 8192, %s636_s12, [#allocation6], %s601_s0, %s601_s0, %s602_s3  }
  0x23   :  { %593 = dma.done.wait [#allocation3], 128  }
  0x24   :  { %594 = vsyncadd [#allocation3], 4294967168 }
  0x25   :  { %595 = dma.done.wait [#allocation6], 8192  }
  0x26   :  { %596 = vsyncadd [#allocation6], 4294959104  ;;  %v603_v0 = vmov 12   ;;  %v604_v1 = vmov 4   ;;  %v667_v2 = vld [vmem:[#allocation2] sm:$0xff]  ;;  %v141_v3 = vld [vmem:[#allocation5 + $0x80] sm:$0xff] }
  0x27   :  { %512 = vset.pattern.permute.xlu1 %v603_v0  ;;  %510 = vset.pattern.permute.xlu0 %v604_v1  ;;  %v142_v4 = vld [vmem:[#allocation5 + $0x88] sm:$0xff]  ;;  %v125_v6 = vld [vmem:[#allocation5] sm:$0xff]  ;;  %v143_v9 = vld [vmem:[#allocation5 + $0x90] sm:$0xff]  ;;  %v605_v14 = vmov 13   ;;  %v606_v15 = vmov 5   ;;  %v607_v23 = vmov 0  }
  0x28   :  { %105 = vperm.xlu1 %512, %v667_v2   ;;  %63 = vperm.xlu0 %510, %v667_v2   ;;  %v424_v5 = vpack.c.bf16 %v142_v4, %v141_v3  ;;  %v126_v7 = vld [vmem:[#allocation5 + $0x8] sm:$0xff]  ;;  %v144_v10 = vld [vmem:[#allocation5 + $0x98] sm:$0xff]  ;;  %v127_v12 = vld [vmem:[#allocation5 + $0x10] sm:$0xff]  ;;  %v608_v24 = vmov 1   ;;  %v609_v36 = vmov 6   ;;  %v610_v37 = vmov 9  }
  0x29   :  { %v426_v8 = vpack.c.bf16 %v126_v7, %v125_v6  ;;  %v428_v11 = vpack.c.bf16 %v144_v10, %v143_v9  ;;  %v128_v13 = vld [vmem:[#allocation5 + $0x18] sm:$0xff]  ;;  %v145_v17 = vld [vmem:[#allocation5 + $0xa0] sm:$0xff]  ;;  %v146_v18 = vld [vmem:[#allocation5 + $0xa8] sm:$0xff]  ;;  %v611_v53 = vmov 8   ;;  %v612_v54 = vmov 7   ;;  %s620_s1 = smov [#allocation7]  }
  0x2a   :  { %425 = vmatprep.subr.bf16.mxu0 %v424_v5  ;;  %v430_v16 = vpack.c.bf16 %v128_v13, %v127_v12  ;;  %v432_v19 = vpack.c.bf16 %v146_v18, %v145_v17  ;;  %v129_v20 = vld [vmem:[#allocation5 + $0x20] sm:$0xff]  ;;  %v130_v21 = vld [vmem:[#allocation5 + $0x28] sm:$0xff]  ;;  %v147_v25 = vld [vmem:[#allocation5 + $0xb0] sm:$0xff]  ;;  %v613_v4 = vmov 14   ;;  %v614_v5 = vmov 3   ;;  %s336_s6 = sshll.u32 %s620_s1, 4  ;;  %s337_s6 = int_to_ptr.vmem [resolvable:$true] %s336_s6 }
  0x2b   :  { %427 = vmatpush3.bf16.msra.mxu0 %v426_v8  ;;  %v434_v22 = vpack.c.bf16 %v130_v21, %v129_v20  ;;  %v148_v26 = vld [vmem:[#allocation5 + $0xb8] sm:$0xff]  ;;  %v131_v28 = vld [vmem:[#allocation5 + $0x30] sm:$0xff]  ;;  %v173_v31 = vld [vmem:[#allocation5 + $0x180] sm:$0xff]  ;;  %v615_v21 = vmov 2   ;;  %s571_s7 = scalar_lea.vmem %s337_s6, 128  ;;  %p576_p3 = scmp.lt.s32.totalorder %s337_s6, %s337_s6 }
  0x2c   :  { %513 = vset.pattern.permute.xlu1 %v605_v14  ;;  %511 = vset.pattern.permute.xlu0 %v606_v15  ;;  %v436_v27 = vpack.c.bf16 %v148_v26, %v147_v25  ;;  %v132_v29 = vld [vmem:[#allocation5 + $0x38] sm:$0xff]  ;;  %v174_v32 = vld [vmem:[#allocation5 + $0x188] sm:$0xff]  ;;  %v157_v34 = vld [vmem:[#allocation5 + $0x100] sm:$0xff]  ;;  %p572_p2 = scmp.ne.s32.totalorder %s337_s6, %s571_s7  ;;  %p577_p4 = scmp.lt.s32.totalorder %s571_s7, %s571_s7 }
  0x2d   :  { %109 = vperm.xlu1 %513, %v667_v2   ;;  %67 = vperm.xlu0 %511, %v667_v2   ;;  %v438_v30 = vpack.c.bf16 %v132_v29, %v131_v28  ;;  %v456_v33 = vpack.c.bf16 %v174_v32, %v173_v31  ;;  %v158_v35 = vld [vmem:[#allocation5 + $0x108] sm:$0xff]  ;;  %v149_v39 = vld [vmem:[#allocation5 + $0xc0] sm:$0xff]  ;;  %v175_v44 = vld [vmem:[#allocation5 + $0x190] sm:$0xff]  ;;  %v617_v32 = vmov 10  }
  0x2e   :  { %429 = vmatprep.subr.bf16.mxu0 %v428_v11  ;;  %v458_v38 = vpack.c.bf16 %v158_v35, %v157_v34  ;;  %v150_v40 = vld [vmem:[#allocation5 + $0xc8] sm:$0xff]  ;;  %v133_v42 = vld [vmem:[#allocation5 + $0x40] sm:$0xff]  ;;  %v176_v45 = vld [vmem:[#allocation5 + $0x198] sm:$0xff]  ;;  %p578_p5 = por %p577_p4, %p576_p3 }
  0x2f   :  { %431 = vmatpush3.bf16.msra.mxu0 %v430_v16  ;;  %v440_v41 = vpack.c.bf16 %v150_v40, %v149_v39  ;;  %v134_v43 = vld [vmem:[#allocation5 + $0x48] sm:$0xff]  ;;  %457 = vmatprep.subr.bf16.mxu1 %v456_v33  ;;  %v460_v47 = vpack.c.bf16 %v176_v45, %v175_v44  ;;  %v159_v48 = vld [vmem:[#allocation5 + $0x110] sm:$0xff]  ;;  %v160_v49 = vld [vmem:[#allocation5 + $0x118] sm:$0xff] }
  0x30   :  { %433 = vmatprep.subr.bf16.mxu0 %v432_v19  ;;  %459 = vmatpush3.bf16.msra.mxu1 %v458_v38  ;;  %v442_v46 = vpack.c.bf16 %v134_v43, %v133_v42  ;;  %v462_v50 = vpack.c.bf16 %v160_v49, %v159_v48  ;;  %v151_v51 = vld [vmem:[#allocation5 + $0xd0] sm:$0xff]  ;;  %v152_v52 = vld [vmem:[#allocation5 + $0xd8] sm:$0xff]  ;;  %v177_v58 = vld [vmem:[#allocation5 + $0x1a0] sm:$0xff]  ;;  %v618_v49 = vmov 11   ;;  %p579_p6 = pnand %p578_p5, %p572_p2 }
  0x31   :  { %514 = vset.pattern.permute.xlu1 %v607_v23  ;;  %515 = vset.pattern.permute.xlu0 %v608_v24  ;;  %v444_v55 = vpack.c.bf16 %v152_v52, %v151_v51  ;;  %v135_v56 = vld [vmem:[#allocation5 + $0x50] sm:$0xff]  ;;  %v136_v57 = vld [vmem:[#allocation5 + $0x58] sm:$0xff]  ;;  %v178_v59 = vld [vmem:[#allocation5 + $0x1a8] sm:$0xff]  ;;  %v616_v24 = vmov 15  }
  0x32   :  { %42 = vperm.xlu1 %514, %v667_v2   ;;  %46 = vperm.xlu0 %515, %v667_v2   ;;  %v446_v60 = vpack.c.bf16 %v136_v57, %v135_v56  ;;  %v464_v61 = vpack.c.bf16 %v178_v59, %v177_v58  ;;  %v161_v62 = vld [vmem:[#allocation5 + $0x120] sm:$0xff]  ;;  %v162_v63 = vld [vmem:[#allocation5 + $0x128] sm:$0xff]  ;;  %v179_v9 = vld [vmem:[#allocation5 + $0x1b0] sm:$0xff] }
  0x33   :  { %435 = vmatpush3.bf16.msra.mxu0 %v434_v22  ;;  %461 = vmatprep.subr.bf16.mxu1 %v460_v47  ;;  %v466_v0 = vpack.c.bf16 %v162_v63, %v161_v62  ;;  %v153_v1 = vld [vmem:[#allocation5 + $0xe0] sm:$0xff]  ;;  %v154_v3 = vld [vmem:[#allocation5 + $0xe8] sm:$0xff]  ;;  %v180_v10 = vld [vmem:[#allocation5 + $0x1b8] sm:$0xff] }
  0x34   :  { %437 = vmatprep.subr.bf16.mxu0 %v436_v27  ;;  %463 = vmatpush3.bf16.msra.mxu1 %v462_v50  ;;  %v448_v6 = vpack.c.bf16 %v154_v3, %v153_v1  ;;  %v137_v7 = vld [vmem:[#allocation5 + $0x60] sm:$0xff]  ;;  %v138_v8 = vld [vmem:[#allocation5 + $0x68] sm:$0xff]  ;;  %v163_v11 = vld [vmem:[#allocation5 + $0x130] sm:$0xff]  ;;  %v468_v13 = vpack.c.bf16 %v180_v10, %v179_v9 }
  0x35   :  { %465 = vmatprep.subr.bf16.mxu1 %v464_v61  ;;  %v450_v12 = vpack.c.bf16 %v138_v8, %v137_v7  ;;  %v164_v14 = vld [vmem:[#allocation5 + $0x138] sm:$0xff]  ;;  %v155_v15 = vld [vmem:[#allocation5 + $0xf0] sm:$0xff]  ;;  %v181_v22 = vld [vmem:[#allocation5 + $0x1c0] sm:$0xff] }
  0x36   :  { %516 = vset.pattern.permute.xlu1 %v609_v36  ;;  %518 = vset.pattern.permute.xlu0 %v610_v37  ;;  %v156_v16 = vld [vmem:[#allocation5 + $0xf8] sm:$0xff]  ;;  %v470_v17 = vpack.c.bf16 %v164_v14, %v163_v11  ;;  %v139_v19 = vld [vmem:[#allocation5 + $0x70] sm:$0xff]  ;;  %v182_v23 = vld [vmem:[#allocation5 + $0x1c8] sm:$0xff] }
  0x37   :  { %72 = vperm.xlu1 %516, %v667_v2   ;;  %88 = vperm.xlu0 %518, %v667_v2   ;;  %v452_v18 = vpack.c.bf16 %v156_v16, %v155_v15  ;;  %v140_v20 = vld [vmem:[#allocation5 + $0x78] sm:$0xff]  ;;  %v472_v26 = vpack.c.bf16 %v182_v23, %v181_v22  ;;  %v165_v27 = vld [vmem:[#allocation5 + $0x140] sm:$0xff]  ;;  %v166_v28 = vld [vmem:[#allocation5 + $0x148] sm:$0xff] }
  0x38   :  { %439 = vmatpush3.bf16.msra.mxu0 %v438_v30  ;;  %467 = vmatpush3.bf16.msra.mxu1 %v466_v0  ;;  %v454_v25 = vpack.c.bf16 %v140_v20, %v139_v19  ;;  %v474_v29 = vpack.c.bf16 %v166_v28, %v165_v27  ;;  %v183_v30 = vld [vmem:[#allocation5 + $0x1d0] sm:$0xff]  ;;  %v184_v31 = vld [vmem:[#allocation5 + $0x1d8] sm:$0xff]  ;;  %v185_v37 = vld [vmem:[#allocation5 + $0x1e0] sm:$0xff] }
  0x39   :  { %441 = vmatprep.subr.bf16.mxu0 %v440_v41  ;;  %469 = vmatprep.subr.bf16.mxu1 %v468_v13  ;;  %v476_v33 = vpack.c.bf16 %v184_v31, %v183_v30  ;;  %v167_v34 = vld [vmem:[#allocation5 + $0x150] sm:$0xff]  ;;  %v168_v35 = vld [vmem:[#allocation5 + $0x158] sm:$0xff]  ;;  %v186_v38 = vld [vmem:[#allocation5 + $0x1e8] sm:$0xff] }
  0x3a   :  { %v478_v36 = vpack.c.bf16 %v168_v35, %v167_v34  ;;  %v480_v39 = vpack.c.bf16 %v186_v38, %v185_v37  ;;  %v169_v40 = vld [vmem:[#allocation5 + $0x160] sm:$0xff]  ;;  %v170_v41 = vld [vmem:[#allocation5 + $0x168] sm:$0xff]  ;;  %v187_v43 = vld [vmem:[#allocation5 + $0x1f0] sm:$0xff] }
  0x3b   :  { %517 = vset.pattern.permute.xlu1 %v611_v53  ;;  %521 = vset.pattern.permute.xlu0 %v612_v54  ;;  %v482_v42 = vpack.c.bf16 %v170_v41, %v169_v40  ;;  %v188_v44 = vld [vmem:[#allocation5 + $0x1f8] sm:$0xff]  ;;  %v39_v54 = vlaneseq }
  0x3c   :  { %84 = vperm.xlu1 %517, %v667_v2   ;;  %77 = vperm.xlu0 %521, %v667_v2   ;;  %v484_v45 = vpack.c.bf16 %v188_v44, %v187_v43  ;;  %v172_v47 = vld [vmem:[#allocation5 + $0x178] sm:$0xff] }
  0x3d   :  { %443 = vmatpush3.bf16.msra.mxu0 %v442_v46  ;;  %471 = vmatpush3.bf16.msra.mxu1 %v470_v17  ;;  %v171_v46 = vld [vmem:[#allocation5 + $0x170] sm:$0xff]  ;;  %v40_v57 = vand.u32 127, %v39_v54 }
  0x3e   :  { %445 = vmatprep.subr.bf16.mxu0 %v444_v55  ;;  %473 = vmatprep.subr.bf16.mxu1 %v472_v26  ;;  %v486_v48 = vpack.c.bf16 %v172_v47, %v171_v46 }
  0x40   :  { %519 = vset.pattern.permute.xlu1 %v613_v4  ;;  %524 = vset.pattern.permute.xlu0 %v614_v5 }
  0x41   :  { %114 = vperm.xlu1 %519, %v667_v2   ;;  %56 = vperm.xlu0 %524, %v667_v2  }
  0x42   :  { %447 = vmatpush3.bf16.msra.mxu0 %v446_v60  ;;  %475 = vmatpush3.bf16.msra.mxu1 %v474_v29 }
  0x43   :  { %449 = vmatprep.subr.bf16.mxu0 %v448_v6  ;;  %477 = vmatprep.subr.bf16.mxu1 %v476_v33 }
  0x45   :  { %520 = vset.pattern.permute.xlu1 %v615_v21  ;;  %526 = vset.pattern.permute.xlu0 %v616_v24 }
  0x46   :  { %51 = vperm.xlu1 %520, %v667_v2   ;;  %451 = vmatpush3.bf16.msra.mxu0 %v450_v12 }
  0x47   :  { %453 = vmatprep.subr.bf16.mxu0 %v452_v18  ;;  %479 = vmatpush3.bf16.msra.mxu1 %v478_v36 }
  0x48   :  { %481 = vmatprep.subr.bf16.mxu1 %v480_v39 }
  0x4a   :  { %522 = vset.pattern.permute.xlu1 %v617_v32  ;;  %455 = vmatpush3.bf16.msra.mxu0 %v454_v25 }
  0x4b   :  { %93 = vperm.xlu1 %522, %v667_v2   ;;  %483 = vmatpush3.bf16.msra.mxu1 %v482_v42 }
  0x4c   :  { %485 = vmatprep.subr.bf16.mxu1 %v484_v45 }
  0x4f   :  { %523 = vset.pattern.permute.xlu1 %v616_v24  ;;  %487 = vmatpush3.bf16.msra.mxu1 %v486_v48 }
  0x50   :  { %119 = vperm.xlu1 %523, %v667_v2  }
  0x54   :  { %525 = vset.pattern.permute.xlu1 %v618_v49 }
  0x55   :  { %98 = vperm.xlu1 %525, %v667_v2   ;;  %v619_v2 = vmov 1.0  }
  0xa7   :  { %v106_v50 = vpop.permute.xlu1 %105  ;;  %v64_v51 = vpop.permute.xlu0 %63 }
  0xa8   :  { %vm65_vm0 = vcmp.eq.s32.totalorder %v40_v57, %v64_v51 }
  0xac   :  { %v110_v52 = vpop.permute.xlu1 %109  ;;  %v68_v53 = vpop.permute.xlu0 %67 }
  0xad   :  { %vm69_vm1 = vcmp.eq.s32.totalorder %v40_v57, %v68_v53  ;;  %vm111_vm14 = vcmp.eq.s32.totalorder %v40_v57, %v110_v52 }
  0xae   :  { %vm70_vm2 = vmor %vm65_vm0, %vm69_vm1  ;;  %vm107_vm0 = vcmp.eq.s32.totalorder %v40_v57, %v106_v50 }
  0xaf   :  { %vm112_vm1 = vmor %vm107_vm0, %vm111_vm14 }
  0xb1   :  { %v43_v55 = vpop.permute.xlu1 %42  ;;  %v47_v56 = vpop.permute.xlu0 %46 }
  0xb2   :  { %vm44_vm7 = vcmp.eq.s32.totalorder %v40_v57, %v43_v55  ;;  %vm48_vm8 = vcmp.eq.s32.totalorder %v40_v57, %v47_v56 }
  0xb3   :  { %vm49_vm10 = vmor %vm44_vm7, %vm48_vm8 }
  0xb6   :  { %v73_v58 = vpop.permute.xlu1 %72  ;;  %v89_v59 = vpop.permute.xlu0 %88 }
  0xb7   :  { %vm74_vm3 = vcmp.eq.s32.totalorder %v40_v57, %v73_v58 }
  0xb8   :  { %vm75_vm5 = vmor %vm70_vm2, %vm74_vm3 }
  0xbb   :  { %v85_v60 = vpop.permute.xlu1 %84  ;;  %v78_v61 = vpop.permute.xlu0 %77 }
  0xbc   :  { %vm79_vm4 = vcmp.eq.s32.totalorder %v40_v57, %v78_v61 }
  0xbd   :  { %vm80_vm6 = vmor %vm75_vm5, %vm79_vm4  ;;  %vm90_vm4 = vcmp.eq.s32.totalorder %v40_v57, %v89_v59  ;;  %vm86_vm5 = vcmp.eq.s32.totalorder %v40_v57, %v85_v60 }
  0xbe   :  { %350 = vmatprep.mubr.msk.f32.mxu0 %vm80_vm6, %v619_v2  ;;  %vm91_vm8 = vmor %vm86_vm5, %vm90_vm4 }
  0xc0   :  { %v115_v62 = vpop.permute.xlu1 %114  ;;  %v57_v63 = vpop.permute.xlu0 %56 }
  0xc1   :  { %vm58_vm9 = vcmp.eq.s32.totalorder %v40_v57, %v57_v63  ;;  %vm116_vm15 = vcmp.eq.s32.totalorder %v40_v57, %v115_v62 }
  0xc2   :  { %vm117_vm3 = vmor %vm112_vm1, %vm116_vm15 }
  0xc5   :  { %v52_v0 = vpop.permute.xlu1 %51 }
  0xc6   :  { %vm53_vm11 = vcmp.eq.s32.totalorder %v40_v57, %v52_v0 }
  0xc7   :  { %vm54_vm12 = vmor %vm49_vm10, %vm53_vm11 }
  0xc8   :  { %vm59_vm13 = vmor %vm54_vm12, %vm58_vm9 }
  0xc9   :  { %351 = vmatmul.mubr.msk.f32.vlgmr.msra.gmra.mrb[0].mxu0 %vm59_vm13, %v619_v2 }
  0xca   :  { %v94_v1 = vpop.permute.xlu1 %93 }
  0xcb   :  { %vm95_vm7 = vcmp.eq.s32.totalorder %v40_v57, %v94_v1 }
  0xcc   :  { %vm96_vm10 = vmor %vm91_vm8, %vm95_vm7 }
  0xcf   :  { %v120_v3 = vpop.permute.xlu1 %119 }
  0xd0   :  { %vm121_vm2 = vcmp.eq.s32.totalorder %v40_v57, %v120_v3 }
  0xd1   :  { %vm122_vm6 = vmor %vm117_vm3, %vm121_vm2 }
  0xd2   :  { %352 = vmatprep.mubr.msk.f32.mxu1 %vm122_vm6, %v619_v2 }
  0xd4   :  { %v99_v4 = vpop.permute.xlu1 %98 }
  0xd5   :  { %vm100_vm11 = vcmp.eq.s32.totalorder %v40_v57, %v99_v4 }
  0xd6   :  { %vm101_vm9 = vmor %vm96_vm10, %vm100_vm11 }
  0xd7   :  { %353 = vmatmul.mubr.msk.f32.vlgmr.msra.gmra.mrb[0].mxu1 %vm101_vm9, %v619_v2 }
 0x19c   :  { %v386_v5 = vpop.f32.mrb[0].mxu0 }
 0x19d   :  { %v387_v6 = vpop.f32.mrb[1].mxu0 }
 0x19e   :  { %v388_v7 = vadd.f32 %v387_v6, %v386_v5 }
 0x1aa   :  { %v421_v8 = vpop.f32.mrb[0].mxu1 }
 0x1ab   :  { %v422_v9 = vpop.f32.mrb[1].mxu1 }
 0x1ac   :  { %v423_v10 = vadd.f32 %v422_v9, %v421_v8 }
 0x1ae   :  { %v326_v11 = vadd.f32 %v423_v10, %v388_v7 }
 0x1b0   :  { %329 = vst [vmem:[#allocation7] sm:$0xff] %v326_v11 }
 0x1b1   :  { %582 = shalt.err (!%p579_p6)
}
 0x1b2   :  { %s583_s10 = scalar_lea.hbm %s699_s2, 128 }
 0x1b3   :  { %p584_p7 = scmp.ne.s32.totalorder %s699_s2, %s583_s10  ;;  %p587_p8 = scmp.lt.u32.totalorder %s583_s10, %s699_s2 }
 0x1b5   :  { %p589_p9 = pnand %p587_p8, %p584_p7 }
 0x1b7   :  { %592 = shalt.err (!%p589_p9)
}
 0x1b8   :  { %339 = dma.vmem_to_hbm [thread:$0]  %s337_s6, 128, %s699_s2, [#allocation4]  }
 0x1b9   :  { %597 = dma.done.wait [#allocation4], 128  }
 0x1ba   :  { %598 = vsyncadd [#allocation4], 4294967168 }
 0x1bb   :  { %343 = vsyncpa [#allocation3], 1 }
 0x1bc   :  { %344 = vsyncpa [#allocation6], 1 }
 0x1bd   :  { %345 = vsyncpa [#allocation4], 1 }

</bundles_post_ra>
